<compile_context>
chip_gen: v6e
topology: v6e:2x2x1
jax: 0.10.0
libtpu: 0.0.40
codegen_flags: <defaults>
</compile_context>

<pallas_src>
import functools
import math

import jax
import jax.numpy as jnp
from jax.experimental import pallas as pl
from jax.experimental.pallas import tpu as pltpu


# ---------------------------------------------------------------------------
# Small helpers.
# ---------------------------------------------------------------------------
def _round_up(a, m):
    return ((a + m - 1) // m) * m


def _sublane(dtype):
    return {4: 8, 2: 16, 1: 32}.get(jnp.dtype(dtype).itemsize, 8)


def _vmem_budget_bytes(headroom=16 << 20):
    """Generation-aware VMEM budget (v5e/v6e: 128 MiB, v7x: 64 MiB) minus headroom."""
    try:
        cap = int(pltpu.get_tpu_info().vmem_capacity_bytes)
    except Exception:
        cap = 64 << 20  # conservative fallback, valid on every generation
    return max(cap - headroom, 16 << 20)


def _pick_tm(M, tm_target, sublane, budget, fixed_bytes, row_bytes):
    """Row-tile choice: as big as fits, then ensure >=2 programs for megacore."""
    tm = max(sublane, min(_round_up(M, sublane), _round_up(tm_target, sublane)))
    # Shrink until the double-buffered streaming tiles (x + out) fit the budget.
    while tm > sublane and fixed_bytes + 2 * tm * row_bytes > budget:
        tm = max(sublane, _round_up(tm // 2, sublane))
    # v7x megacore: give the "parallel" M axis at least two programs when M is big
    # enough that the extra grid step (~0.35 us) is negligible.
    if pl.cdiv(M, tm) < 2 and M >= 256:
        tm = max(sublane, _round_up(pl.cdiv(M, 2), sublane))
    return tm


# ---------------------------------------------------------------------------
# Kernels.
# ---------------------------------------------------------------------------
def _sep_linear_fused_kernel(x_ref, w_ref, b_ref, o_ref):
    # One MXU dot over the block-diagonal weight; single lane-dense store.
    acc = jnp.dot(x_ref[...], w_ref[...], preferred_element_type=jnp.float32)
    o_ref[...] = (acc + b_ref[...]).astype(o_ref.dtype)


def _sep_linear_split_kernel(x_ref, w1_ref, w2_ref, b_ref, o_ref, *,
                             sep_idx, out_dim1):
    # Two real matmuls into adjacent 128-aligned column ranges (no zero-block waste).
    x = x_ref[...]
    b = b_ref[...]
    y1 = jnp.dot(x[:, :sep_idx], w1_ref[...], preferred_element_type=jnp.float32)
    y2 = jnp.dot(x[:, sep_idx:], w2_ref[...], preferred_element_type=jnp.float32)
    o_ref[:, :out_dim1] = (y1 + b[:, :out_dim1]).astype(o_ref.dtype)
    o_ref[:, out_dim1:] = (y2 + b[:, out_dim1:]).astype(o_ref.dtype)


# ---------------------------------------------------------------------------
# One-time parameter preparation (cold path, do OUTSIDE the hot loop).
# ---------------------------------------------------------------------------
def prepare_sep_linear_params(w1, b1, w2, b2, *, param_dtype=None):
    """Returns a params dict for `sep_linear`.

    * 128-lane-aligned splits -> 'split' mode: keep the two transposed weights
      separate; the kernel runs two real matmuls (no 2x FLOP / byte waste).
    * Otherwise -> 'fused' mode: block-diagonal weight with output columns padded
      to a multiple of 128 so stores are lane-dense.
      NOTE: the zero blocks make 0*inf / 0*NaN leak NaN across the two partitions
      for non-finite inputs, unlike the reference two-matmul form.
    * param_dtype=jnp.bfloat16 halves weight VMEM/HBM bytes and hits native MXU
      rate (cast x to bfloat16 too); default keeps the original dtype (exact).
    """
    out_dim1, sep_idx = w1.shape
    out_dim2, rest_dim = w2.shape
    in_dim = sep_idx + rest_dim
    out_dim = out_dim1 + out_dim2

    dtype = (jnp.dtype(param_dtype) if param_dtype is not None
             else jnp.promote_types(w1.dtype, w2.dtype))
    if b1 is None:
        b1 = jnp.zeros((out_dim1,), dtype)
    if b2 is None:
        b2 = jnp.zeros((out_dim2,), dtype)
    w1 = w1.astype(dtype)
    w2 = w2.astype(dtype)
    b = jnp.concatenate([b1.astype(dtype), b2.astype(dtype)]).reshape(1, out_dim)

    aligned = (sep_idx % 128 == 0 and rest_dim % 128 == 0
               and out_dim1 % 128 == 0 and out_dim2 % 128 == 0)
    common = dict(sep_idx=sep_idx, in_dim=in_dim, out_dim=out_dim, out_dim1=out_dim1)

    if aligned:
        return dict(mode="split", w1t=w1.T, w2t=w2.T, b=b, **common)

    out_p = _round_up(out_dim, 128)          # lane-dense output stores
    w = jnp.zeros((in_dim, out_p), dtype)
    w = w.at[:sep_idx, :out_dim1].set(w1.T)
    w = w.at[sep_idx:, out_dim1:out_dim].set(w2.T)
    b_p = jnp.zeros((1, out_p), dtype).at[:, :out_dim].set(b)
    return dict(mode="fused", w=w, b=b_p, **common)


# ---------------------------------------------------------------------------
# Forward wrapper.
# ---------------------------------------------------------------------------
def sep_linear(x, params, *, tm_target=1024):
    """Apply SepLinear to x[..., in_dim] -> [..., out_dim] with prepared params."""
    mode = params["mode"]
    sep_idx, in_dim = params["sep_idx"], params["in_dim"]
    out_dim, out_dim1 = params["out_dim"], params["out_dim1"]

    *lead, in_dim_x = x.shape
    assert in_dim_x == in_dim, (in_dim_x, in_dim)
    M = math.prod(lead)
    if M == 0:
        return jnp.zeros((*lead, out_dim), x.dtype)
    x2d = x.reshape(M, in_dim)

    isz = jnp.dtype(x.dtype).itemsize
    sublane = _sublane(x.dtype)
    budget = _vmem_budget_bytes()

    if mode == "fused":
        w, b = params["w"], params["b"]
        out_p = w.shape[1]
        w_isz = jnp.dtype(w.dtype).itemsize
        resident_bytes = (in_dim * out_p + out_p) * w_isz  # single-buffered

        if resident_bytes <= budget // 2:
            # Whole weight resident in VMEM -> read from HBM exactly once.
            tm = _pick_tm(M, tm_target, sublane, budget,
                          fixed_bytes=resident_bytes,
                          row_bytes=(in_dim + out_p) * isz)
            cost = pl.CostEstimate(
                flops=2 * M * in_dim * out_p, transcendentals=0,
                bytes_accessed=M * (in_dim + out_p) * isz + resident_bytes)
            out2d = pl.pallas_call(
                _sep_linear_fused_kernel,
                out_shape=jax.ShapeDtypeStruct((M, out_p), x.dtype),
                grid_spec=pltpu.PrefetchScalarGridSpec(
                    num_scalar_prefetch=0,
                    grid=(pl.cdiv(M, tm),),
                    in_specs=[
                        pl.BlockSpec((tm, in_dim), lambda i: (i, 0)),
                        # Grid-invariant weight/bias: whole-array, single-buffered VMEM.
                        pl.BlockSpec(memory_space=pltpu.MemorySpace.VMEM),
                        pl.BlockSpec(memory_space=pltpu.MemorySpace.VMEM),
                    ],
                    out_specs=pl.BlockSpec((tm, out_p), lambda i: (i, 0))),
                compiler_params=pltpu.CompilerParams(
                    dimension_semantics=("parallel",),
                    vmem_limit_bytes=int(budget)),
                cost_estimate=cost,
            )(x2d, w, b)
        else:
            # Weight too large to sit resident (e.g. v7x 64 MiB): tile output columns.
            share = max(budget // 3, 1 << 20)
            tn = (share // (2 * in_dim * w_isz)) // 256 * 256   # multiple of 256 (MXU tile)
            tn = int(max(256, min(tn, _round_up(out_p, 256))))
            fixed = 2 * (in_dim * tn + tn) * w_isz              # double-buffered weight stripe
            tm = _pick_tm(M, tm_target, sublane, budget,
                          fixed_bytes=fixed, row_bytes=(in_dim + tn) * isz)
            n_tiles, m_tiles = pl.cdiv(out_p, tn), pl.cdiv(M, tm)
            cost = pl.CostEstimate(
                flops=2 * M * in_dim * out_p, transcendentals=0,
                bytes_accessed=((n_tiles * M * in_dim + M * out_p) * isz
                                + (in_dim * out_p + out_p) * w_isz))
            # TODO(synk): add K tiling + f32 VMEM accumulator for very large in_dim.
            out2d = pl.pallas_call(
                _sep_linear_fused_kernel,
                out_shape=jax.ShapeDtypeStruct((M, out_p), x.dtype),
                grid_spec=pltpu.PrefetchScalarGridSpec(
                    num_scalar_prefetch=0,
                    grid=(n_tiles, m_tiles),   # N outer: weight stripe resident across M
                    in_specs=[
                        pl.BlockSpec((tm, in_dim), lambda j, i: (i, 0)),
                        pl.BlockSpec((in_dim, tn), lambda j, i: (0, j)),
                        pl.BlockSpec((1, tn), lambda j, i: (0, j)),
                    ],
                    out_specs=pl.BlockSpec((tm, tn), lambda j, i: (i, j))),
                compiler_params=pltpu.CompilerParams(
                    dimension_semantics=("parallel", "parallel"),
                    vmem_limit_bytes=int(budget)),
                cost_estimate=cost,
            )(x2d, w, b)
    else:
        # 128-aligned split: two real matmuls, adjacent lane-aligned column stores.
        w1t, w2t, b = params["w1t"], params["w2t"], params["b"]
        w_isz = jnp.dtype(w1t.dtype).itemsize
        resident_bytes = (w1t.size + w2t.size + out_dim) * w_isz
        # TODO(synk): add N/K tiling for the split path when the two weights exceed VMEM.
        tm = _pick_tm(M, tm_target, sublane, budget,
                      fixed_bytes=resident_bytes,
                      row_bytes=(in_dim + out_dim) * isz)
        cost = pl.CostEstimate(
            flops=2 * M * (sep_idx * out_dim1
                           + (in_dim - sep_idx) * (out_dim - out_dim1)),
            transcendentals=0,
            bytes_accessed=M * (in_dim + out_dim) * isz + resident_bytes)
        kernel = functools.partial(_sep_linear_split_kernel,
                                   sep_idx=sep_idx, out_dim1=out_dim1)
        out2d = pl.pallas_call(
            kernel,
            out_shape=jax.ShapeDtypeStruct((M, out_dim), x.dtype),
            grid_spec=pltpu.PrefetchScalarGridSpec(
                num_scalar_prefetch=0,
                grid=(pl.cdiv(M, tm),),
                in_specs=[
                    pl.BlockSpec((tm, in_dim), lambda i: (i, 0)),
                    pl.BlockSpec(memory_space=pltpu.MemorySpace.VMEM),
                    pl.BlockSpec(memory_space=pltpu.MemorySpace.VMEM),
                    pl.BlockSpec(memory_space=pltpu.MemorySpace.VMEM),
                ],
                out_specs=pl.BlockSpec((tm, out_dim), lambda i: (i, 0))),
            compiler_params=pltpu.CompilerParams(
                dimension_semantics=("parallel",),
                vmem_limit_bytes=int(budget)),
            cost_estimate=cost,
        )(x2d, w1t, w2t, b)

    if out2d.shape[1] != out_dim:
        # Strip the lane padding; consumers that accept the padded width can skip this.
        out2d = out2d[:, :out_dim]
    return out2d.reshape(*lead, out_dim)


# ---------------------------------------------------------------------------
# Deterministic parameter init mirroring nn.Linear shapes / default init.
# ---------------------------------------------------------------------------
def make_sep_linear_params(key, sep_idx, in_dim, out_dim, dtype=jnp.float32):
    out_dim1 = int(out_dim * sep_idx / in_dim)
    out_dim2 = out_dim - out_dim1
    k1, k2, k3, k4 = jax.random.split(key, 4)
    lim1 = 1.0 / (sep_idx ** 0.5)
    lim2 = 1.0 / ((in_dim - sep_idx) ** 0.5)
    w1 = jax.random.uniform(k1, (out_dim1, sep_idx), dtype, -lim1, lim1)
    b1 = jax.random.uniform(k2, (out_dim1,), dtype, -lim1, lim1)
    w2 = jax.random.uniform(k3, (out_dim2, in_dim - sep_idx), dtype, -lim2, lim2)
    b2 = jax.random.uniform(k4, (out_dim2,), dtype, -lim2, lim2)
    return w1, b1, w2, b2


def _reference(x, sep_idx, w1, b1, w2, b2):
    # Pure-JAX reference mirroring the PyTorch module exactly.
    return jnp.concatenate([x[..., :sep_idx] @ w1.T + b1,
                            x[..., sep_idx:] @ w2.T + b2], axis=-1)


if __name__ == "__main__":
    key = jax.random.PRNGKey(0)

    # Case 1: small, non-128-aligned split -> fused block-diagonal path.
    # batch=2, seq=8, in_dim=32, out_dim=64, sep_idx=8 -> out_dim1=16, out_dim2=48.
    sep_idx, in_dim, out_dim = 8, 32, 64
    k1, k2, key = jax.random.split(key, 3)
    x = jax.random.normal(k1, (2, 8, in_dim), jnp.float32)
    w1, b1, w2, b2 = make_sep_linear_params(k2, sep_idx, in_dim, out_dim)
    params = prepare_sep_linear_params(w1, b1, w2, b2)
    assert params["mode"] == "fused"
    y = jax.block_until_ready(sep_linear(x, params))
    ref = _reference(x, sep_idx, w1, b1, w2, b2)
    assert y.shape == (2, 8, out_dim), y.shape
    assert jnp.allclose(y, ref, atol=1e-4, rtol=1e-4), float(jnp.abs(y - ref).max())

    # Case 2: 128-aligned split -> two-matmul (no zero-block) path.
    sep_idx, in_dim, out_dim = 128, 256, 256
    k1, k2, key = jax.random.split(key, 3)
    x = jax.random.normal(k1, (2, 8, in_dim), jnp.float32)
    w1, b1, w2, b2 = make_sep_linear_params(k2, sep_idx, in_dim, out_dim)
    params = prepare_sep_linear_params(w1, b1, w2, b2)
    assert params["mode"] == "split"
    y = jax.block_until_ready(sep_linear(x, params))
    ref = _reference(x, sep_idx, w1, b1, w2, b2)
    assert y.shape == (2, 8, out_dim), y.shape
    assert jnp.allclose(y, ref, atol=1e-4, rtol=1e-4), float(jnp.abs(y - ref).max())

    print("KERNEL_OK")
</pallas_src>

<mosaic_0001>
module attributes {stable_mosaic.version = 11 : i64} {
  func.func @_sep_linear_fused_kernel(%arg0: i32, %arg1: memref<16x32xf32, #tpu.memory_space<vmem>>, %arg2: memref<32x128xf32, #tpu.memory_space<vmem>>, %arg3: memref<1x128xf32, #tpu.memory_space<vmem>>, %arg4: memref<16x128xf32, #tpu.memory_space<vmem>>) attributes {dimension_semantics = [#tpu.dimension_semantics<parallel>], iteration_bounds = array<i64: 1>, scalar_prefetch = 0 : i64, scratch_operands = 0 : i64, tpu.core_type = #tpu.core_type<tc>, window_params = [{transform_indices = @transform_0, window_bounds = array<i64: 16, 32>}, {pipeline_mode = #tpu.pipeline_mode<synchronous>, transform_indices = @transform_1, window_bounds = array<i64: 32, 128>}, {pipeline_mode = #tpu.pipeline_mode<synchronous>, transform_indices = @transform_2, window_bounds = array<i64: 1, 128>}, {transform_indices = @transform_3, window_bounds = array<i64: 16, 128>}]} {
    %c0 = arith.constant 0 : index
    %c0_0 = arith.constant 0 : index
    %0 = vector.load %arg1[%c0, %c0_0] : memref<16x32xf32, #tpu.memory_space<vmem>>, vector<16x32xf32>
    %c0_1 = arith.constant 0 : index
    %c0_2 = arith.constant 0 : index
    %1 = vector.load %arg2[%c0_1, %c0_2] : memref<32x128xf32, #tpu.memory_space<vmem>>, vector<32x128xf32>
    %cst = arith.constant dense<0.000000e+00> : vector<16x128xf32>
    %2 = tpu.matmul %0, %1, %cst {dimension_numbers = #tpu.dot_dimension_numbers<[1], [0], [0], [1], [0, 0, 1, 1], [], []>} : vector<16x32xf32>, vector<32x128xf32>, vector<16x128xf32> -> vector<16x128xf32>
    %c0_3 = arith.constant 0 : index
    %c0_4 = arith.constant 0 : index
    %3 = vector.load %arg3[%c0_3, %c0_4] : memref<1x128xf32, #tpu.memory_space<vmem>>, vector<1x128xf32>
    %4 = vector.broadcast %3 : vector<1x128xf32> to vector<16x128xf32>
    %5 = arith.addf %2, %4 : vector<16x128xf32>
    %c0_5 = arith.constant 0 : index
    %c0_6 = arith.constant 0 : index
    %6 = vector.load %arg4[%c0_5, %c0_6] : memref<16x128xf32, #tpu.memory_space<vmem>>, vector<16x128xf32>
    tpu.vector_store %arg4[%c0_5, %c0_6], %5 {strides = array<i32>} : memref<16x128xf32, #tpu.memory_space<vmem>>, vector<16x128xf32>,
    return
  }
  func.func @transform_0(%arg0: i32) -> (i32, i32) {
    %c0_i32 = arith.constant 0 : i32
    %c0_i32_0 = arith.constant 0 : i32
    return %arg0, %c0_i32 : i32, i32
  }
  func.func @transform_1(%arg0: i32) -> (i32, i32) {
    %c0_i32 = arith.constant 0 : i32
    %c0_i32_0 = arith.constant 0 : i32
    %c0_i32_1 = arith.constant 0 : i32
    return %c0_i32, %c0_i32_0 : i32, i32
  }
  func.func @transform_2(%arg0: i32) -> (i32, i32) {
    %c0_i32 = arith.constant 0 : i32
    %c0_i32_0 = arith.constant 0 : i32
    %c0_i32_1 = arith.constant 0 : i32
    return %c0_i32, %c0_i32_0 : i32, i32
  }
  func.func @transform_3(%arg0: i32) -> (i32, i32) {
    %c0_i32 = arith.constant 0 : i32
    %c0_i32_0 = arith.constant 0 : i32
    return %arg0, %c0_i32 : i32, i32
  }
}

</mosaic_0001>

<bundles_post_ra>
// kernel: tpu_custom_call.1
= control target key start
LH: loop header
LB: loop body
LE: loop exit
PB: predicated region body
PF: predicated region fallthrough
CT: control target
= control target key end

     0   :  { %8 = vsyncpa [#allocation3], 0  ;;  %s297_s0 = inlined_call_operand.hbm [shape: f32[16,32], index: 0, kind: input, shape index: {}]   ;;  %s298_s1 = inlined_call_operand.hbm [shape: f32[32,128], index: 1, kind: input, shape index: {}]   ;;  %s299_s2 = inlined_call_operand.vmem [shape: f32[1,128], index: 2, kind: input, shape index: {}]   ;;  %s300_s3 = inlined_call_operand.hbm [shape: f32[16,128], index: 3, kind: output, shape index: {}]  }
   0x1   :  { %9 = vsyncpa [#allocation6], 0 }
   0x2   :  { %10 = vsyncpa [#allocation4], 0  ;;  %s249_s12 = smov [#allocation2]  }
   0x3   :  { %s16_s13 = sshll.u32 %s249_s12, 4  ;;  %s17_s13 = int_to_ptr.vmem [resolvable:$true] %s16_s13 }
   0x4   :  { %s191_s14 = scalar_lea.vmem %s17_s13, 256  ;;  %p196_p1 = scmp.lt.s32.totalorder %s17_s13, %s17_s13 }
   0x5   :  { %p192_p0 = scmp.ne.s32.totalorder %s17_s13, %s191_s14  ;;  %p197_p2 = scmp.lt.s32.totalorder %s191_s14, %s191_s14 }
   0x7   :  { %p198_p3 = por %p197_p2, %p196_p1 }
   0x9   :  { %p199_p4 = pnand %p198_p3, %p192_p0 }
   0xb   :  { %202 = shalt.err (!%p199_p4)
}
   0xc   :  { %s250_s15 = smov 128   ;;  %s251_s16 = smov 8  }
   0xd   :  { %22 = dma.hbm_to_vmem [thread:$0]  %s297_s0, 256, %s17_s13, [#allocation3], %s250_s15, %s250_s15, %s251_s16  }
   0xe   :  { %s252_s19 = smov [#allocation5]  }
   0xf   :  { %s28_s20 = sshll.u32 %s252_s19, 4  ;;  %s29_s20 = int_to_ptr.vmem [resolvable:$true] %s28_s20 }
  0x10   :  { %s211_s21 = scalar_lea.vmem %s29_s20, 512  ;;  %p216_p6 = scmp.lt.s32.totalorder %s29_s20, %s29_s20 }
  0x11   :  { %p212_p5 = scmp.ne.s32.totalorder %s29_s20, %s211_s21  ;;  %p217_p7 = scmp.lt.s32.totalorder %s211_s21, %s211_s21 }
  0x13   :  { %p218_p8 = por %p217_p7, %p216_p6 }
  0x15   :  { %p219_p9 = pnand %p218_p8, %p212_p5 }
  0x17   :  { %222 = shalt.err (!%p219_p9)
}
  0x18   :  { %34 = dma.hbm_to_vmem [thread:$0]  %s298_s1, 512, %s29_s20, [#allocation6], %s250_s15, %s250_s15, %s251_s16  }
  0x19   :  { %243 = dma.done.wait [#allocation3], 256  }
  0x1a   :  { %244 = vsyncadd [#allocation3], 4294967040 }
  0x1b   :  { %245 = dma.done.wait [#allocation6], 512  }
  0x1c   :  { %246 = vsyncadd [#allocation6], 4294966784  ;;  %vm56_vm0 = vcmask 261120   ;;  %v48_v0 = vld [vmem:[#allocation5 + $0x18] sm:$0xff]  ;;  %v47_v1 = vld [vmem:[#allocation5 + $0x10] sm:$0xff]  ;;  %s253_s24 = smov [#allocation7]  }
  0x1d   :  { %167 = vmatprep.subr.mxu0 %v48_v0  ;;  %v43_v2 = vld [vmem:[#allocation2] sm:$0xff]  ;;  %v46_v3 = vld [vmem:[#allocation5 + $0x8] sm:$0xff]  ;;  %v45_v4 = vld [vmem:[#allocation5] sm:$0xff]  ;;  %s145_s25 = sshll.u32 %s253_s24, 4  ;;  %s146_s25 = int_to_ptr.vmem [resolvable:$true] %s145_s25 }
  0x1e   :  { %168 = vmatpush3.msra.mxu0 %v48_v0  ;;  %175 = vmatprep.mubr.msk.f32.mxu0 %vm56_vm0, %v43_v2  ;;  %v44_v5 = vld [vmem:[#allocation2 + $0x8] sm:$0xff]  ;;  %v158_v6 = vld [vmem:[%s299_s2] ss:$0 sm:$0xff]  ;;  %s223_s26 = scalar_lea.vmem %s146_s25, 256  ;;  %p228_p11 = scmp.lt.s32.totalorder %s146_s25, %s146_s25 }
  0x1f   :  { %169 = vmatprep.subr.mxu0 %v47_v1  ;;  %p224_p10 = scmp.ne.s32.totalorder %s146_s25, %s223_s26  ;;  %p229_p12 = scmp.lt.s32.totalorder %s223_s26, %s223_s26 }
  0x20   :  { %170 = vmatpush3.msra.mxu0 %v47_v1 }
  0x21   :  { %171 = vmatprep.subr.mxu0 %v46_v3  ;;  %p230_p13 = por %p229_p12, %p228_p11 }
  0x22   :  { %172 = vmatpush3.msra.mxu0 %v46_v3 }
  0x23   :  { %173 = vmatprep.subr.mxu0 %v45_v4  ;;  %p231_p0 = pnand %p230_p13, %p224_p10 }
  0x24   :  { %174 = vmatpush3.msra.mxu0 %v45_v4 }
  0x25   :  { %176 = vmatmul.mubr.msk.f32.vlgmr.msra.gmra.mxu0 %vm56_vm0, %v44_v5 }
  0xe5   :  { %v177_v7 = vpop.f32.mrf.mxu0 }
  0xe6   :  { %v135_v8 = vadd.f32 %v177_v7, %v158_v6 }
  0xe7   :  { %v129_v9 = vpop.f32.mrf.mxu0 }
  0xe8   :  { %139 = vst [vmem:[#allocation7 + $0x8] sm:$0xff] %v135_v8  ;;  %v130_v10 = vadd.f32 %v158_v6, %v129_v9 }
  0xea   :  { %138 = vst [vmem:[#allocation7] sm:$0xff] %v130_v10 }
  0xeb   :  { %234 = shalt.err (!%p231_p0)
}
  0xec   :  { %151 = dma.vmem_to_hbm [thread:$0]  %s146_s25, 256, %s300_s3, [#allocation4], %s250_s15, %s250_s15, %s251_s16  }
  0xed   :  { %247 = dma.done.wait [#allocation4], 256  }
  0xee   :  { %248 = vsyncadd [#allocation4], 4294967040 }
  0xef   :  { %155 = vsyncpa [#allocation3], 1 }
  0xf0   :  { %156 = vsyncpa [#allocation6], 1 }
  0xf1   :  { %157 = vsyncpa [#allocation4], 1 }

</bundles_post_ra>
